<compile_context>
chip_gen: v6e
topology: v6e:2x2x1
jax: 0.10.0
libtpu: 0.0.40
codegen_flags: <defaults>
</compile_context>

<pallas_src>
import jax
import jax.numpy as jnp
from jax.experimental import pallas as pl
from jax.experimental.pallas import tpu as pltpu


LANE = 128                                  # TPU lane width (pad feature dims to this)
FUSED_VMEM_BUDGET = 32 * 1024 * 1024        # fused path only if resident data fits this
VMEM_LIMIT = 48 * 1024 * 1024               # scoped-VMEM cap (safe on v5e/v6e/v7x)


def round_up(x, m):
    return ((x + m - 1) // m) * m


# ----------------------------------------------------------------------------
# Fused whole-forward kernel (small / medium graphs)
# ----------------------------------------------------------------------------
def _make_fused_kernel(n_layers, n_classes):
    """relu(A @ (H @ W_i) + b_i) for every layer, then masked log_softmax."""

    def kernel(*refs):
        a = refs[0][...]                    # bf16 (N_pad, N_pad)
        h = refs[1][...]                    # bf16 (N_pad, F0_pad)
        o_ref = refs[2 + 2 * n_layers]
        z = None
        for i in range(n_layers):
            w = refs[2 + 2 * i][...]        # bf16 (F_in_pad, F_out_pad)
            b = refs[3 + 2 * i][...]        # f32  (1, F_out_pad)
            xw = jnp.dot(h, w, preferred_element_type=jnp.float32)
            z = jnp.dot(a, xw.astype(jnp.bfloat16),
                        preferred_element_type=jnp.float32)
            z = jnp.maximum(z + b, 0.0)     # ReLU on every layer (matches spec)
            h = z.astype(jnp.bfloat16)
        # masked log_softmax over the real class lanes (pad lanes -> -inf)
        col = jax.lax.broadcasted_iota(jnp.int32, z.shape, 1)
        valid = col < n_classes
        logits = jnp.where(valid, z, -jnp.inf)
        m = jnp.max(logits, axis=-1, keepdims=True)
        s = logits - m
        e = jnp.where(valid, jnp.exp(s), 0.0)
        lse = jnp.log(jnp.sum(e, axis=-1, keepdims=True))
        o_ref[...] = s - lse

    return kernel


def _fused_forward(a_norm, x, params, n_classes):
    n, f0 = x.shape
    n_pad = round_up(max(n, 8), LANE)
    f0_pad = round_up(f0, LANE)

    a_pad = jnp.zeros((n_pad, n_pad), jnp.bfloat16).at[:n, :n].set(
        a_norm.astype(jnp.bfloat16))
    x_pad = jnp.zeros((n_pad, f0_pad), jnp.bfloat16).at[:n, :f0].set(
        x.astype(jnp.bfloat16))

    operands = [a_pad, x_pad]
    f_in_pad = f0_pad
    flops = 0
    bytes_accessed = a_pad.size * 2 + x_pad.size * 2
    for (w, b) in params:
        f_in, f_out = w.shape
        f_out_pad = round_up(f_out, LANE)
        w_pad = jnp.zeros((f_in_pad, f_out_pad), jnp.bfloat16).at[:f_in, :f_out].set(
            w.astype(jnp.bfloat16))
        b_pad = jnp.zeros((1, f_out_pad), jnp.float32).at[0, :f_out].set(b)
        operands += [w_pad, b_pad]
        flops += 2 * n_pad * f_in_pad * f_out_pad + 2 * n_pad * n_pad * f_out_pad
        bytes_accessed += w_pad.size * 2 + b_pad.size * 4
        f_in_pad = f_out_pad
    c_pad = f_in_pad
    bytes_accessed += n_pad * c_pad * 4

    out = pl.pallas_call(
        _make_fused_kernel(len(params), n_classes),
        out_shape=jax.ShapeDtypeStruct((n_pad, c_pad), jnp.float32),
        in_specs=[pl.BlockSpec(op.shape, lambda: (0, 0)) for op in operands],
        out_specs=pl.BlockSpec((n_pad, c_pad), lambda: (0, 0)),
        compiler_params=pltpu.CompilerParams(vmem_limit_bytes=VMEM_LIMIT),
        cost_estimate=pl.CostEstimate(
            flops=flops,
            transcendentals=n_pad * c_pad,
            bytes_accessed=bytes_accessed),
    )(*operands)
    return out[:n, :n_classes]


# ----------------------------------------------------------------------------
# Tiled fallback kernels (graphs larger than VMEM)
# ----------------------------------------------------------------------------
def _xw_kernel(x_ref, w_ref, o_ref):
    """XW = X @ W, computed once per layer (row-block grid)."""
    o_ref[...] = jnp.dot(x_ref[...], w_ref[...],
                         preferred_element_type=jnp.float32).astype(o_ref.dtype)


def _aggregate_kernel(a_ref, xw_ref, b_ref, o_ref, acc_ref):
    """relu(A @ XW + b); grid = (row blocks "parallel", K blocks "arbitrary")."""
    @pl.when(pl.program_id(1) == 0)
    def _():
        acc_ref[...] = jnp.zeros_like(acc_ref)

    acc_ref[...] += jnp.dot(a_ref[...], xw_ref[...],
                            preferred_element_type=jnp.float32)

    @pl.when(pl.program_id(1) == pl.num_programs(1) - 1)
    def _():
        z = acc_ref[...] + b_ref[...]
        o_ref[...] = jnp.maximum(z, 0.0).astype(o_ref.dtype)


def _make_log_softmax_kernel(n_classes):
    def kernel(x_ref, o_ref):
        z = x_ref[...].astype(jnp.float32)
        col = jax.lax.broadcasted_iota(jnp.int32, z.shape, 1)
        valid = col < n_classes
        logits = jnp.where(valid, z, -jnp.inf)
        m = jnp.max(logits, axis=-1, keepdims=True)
        s = logits - m
        e = jnp.where(valid, jnp.exp(s), 0.0)
        lse = jnp.log(jnp.sum(e, axis=-1, keepdims=True))
        o_ref[...] = s - lse
    return kernel


def _tiled_layer(a_pad, h_pad, w_pad, b_pad, *, tm, tk, out_dtype):
    n_pad = a_pad.shape[0]
    f_in_pad = h_pad.shape[1]
    f_out_pad = w_pad.shape[1]

    # Stage 1: XW = H @ W (weights are tiny; grid only over node row blocks)
    xw = pl.pallas_call(
        _xw_kernel,
        out_shape=jax.ShapeDtypeStruct((n_pad, f_out_pad), jnp.bfloat16),
        grid=(n_pad // tm,),
        in_specs=[
            pl.BlockSpec((tm, f_in_pad), lambda i: (i, 0)),
            pl.BlockSpec((f_in_pad, f_out_pad), lambda i: (0, 0)),
        ],
        out_specs=pl.BlockSpec((tm, f_out_pad), lambda i: (i, 0)),
        compiler_params=pltpu.CompilerParams(
            dimension_semantics=("parallel",),
            vmem_limit_bytes=VMEM_LIMIT),
    )(h_pad, w_pad)

    # Stage 2: relu(A @ XW + b) with f32 accumulator over the K (node) axis
    out_bytes = n_pad * f_out_pad * jnp.dtype(out_dtype).itemsize
    out = pl.pallas_call(
        _aggregate_kernel,
        out_shape=jax.ShapeDtypeStruct((n_pad, f_out_pad), out_dtype),
        grid=(n_pad // tm, n_pad // tk),
        in_specs=[
            pl.BlockSpec((tm, tk), lambda i, k: (i, k)),
            pl.BlockSpec((tk, f_out_pad), lambda i, k: (k, 0)),
            pl.BlockSpec((1, f_out_pad), lambda i, k: (0, 0)),
        ],
        out_specs=pl.BlockSpec((tm, f_out_pad), lambda i, k: (i, 0)),
        scratch_shapes=[pltpu.VMEM((tm, f_out_pad), jnp.float32)],
        compiler_params=pltpu.CompilerParams(
            dimension_semantics=("parallel", "arbitrary"),
            vmem_limit_bytes=VMEM_LIMIT),
        cost_estimate=pl.CostEstimate(
            flops=2 * n_pad * n_pad * f_out_pad,
            transcendentals=0,
            bytes_accessed=n_pad * n_pad * 2 + n_pad * f_out_pad * 2 + out_bytes),
    )(a_pad, xw, b_pad)
    return out


def _tiled_forward(a_norm, x, params, n_classes, *, tm=256, tk=256):
    # tm/tk = 256 keeps v6e/v7x MXU tiles full; on v7x the "parallel" row axis
    # is shared across the 2 TensorCores.
    n, f0 = x.shape
    blk = max(tm, tk)
    n_pad = round_up(max(n, blk), blk)
    f0_pad = round_up(f0, LANE)

    a_pad = jnp.zeros((n_pad, n_pad), jnp.bfloat16).at[:n, :n].set(
        a_norm.astype(jnp.bfloat16))
    h = jnp.zeros((n_pad, f0_pad), jnp.bfloat16).at[:n, :f0].set(
        x.astype(jnp.bfloat16))

    f_in_pad = f0_pad
    f_out_pad = f0_pad
    for li, (w, b) in enumerate(params):
        f_in, f_out = w.shape
        f_out_pad = round_up(f_out, LANE)
        w_pad = jnp.zeros((f_in_pad, f_out_pad), jnp.bfloat16).at[:f_in, :f_out].set(
            w.astype(jnp.bfloat16))
        b_pad = jnp.zeros((1, f_out_pad), jnp.float32).at[0, :f_out].set(b)
        last = li == len(params) - 1
        h = _tiled_layer(a_pad, h, w_pad, b_pad, tm=tm, tk=tk,
                         out_dtype=jnp.float32 if last else jnp.bfloat16)
        f_in_pad = f_out_pad

    out = pl.pallas_call(
        _make_log_softmax_kernel(n_classes),
        out_shape=jax.ShapeDtypeStruct((n_pad, f_out_pad), jnp.float32),
        grid=(n_pad // tm,),
        in_specs=[pl.BlockSpec((tm, f_out_pad), lambda i: (i, 0))],
        out_specs=pl.BlockSpec((tm, f_out_pad), lambda i: (i, 0)),
        compiler_params=pltpu.CompilerParams(
            dimension_semantics=("parallel",),
            vmem_limit_bytes=VMEM_LIMIT),
    )(h)
    return out[:n, :n_classes]


# ----------------------------------------------------------------------------
# GCN model (forward semantics of the PyTorch module)
# ----------------------------------------------------------------------------
def build_normalized_adjacency(edge_index, num_nodes):
    """Dense D^{-1/2} (A + I) D^{-1/2}, the GCNConv normalization."""
    src, dst = edge_index[0], edge_index[1]
    a = jnp.zeros((num_nodes, num_nodes), jnp.float32)
    a = a.at[src, dst].set(1.0)
    a = a.at[dst, src].set(1.0)             # treat graph as undirected
    a_hat = jnp.maximum(a, jnp.eye(num_nodes, dtype=jnp.float32))  # self loops
    deg = jnp.sum(a_hat, axis=1)
    d_inv_sqrt = 1.0 / jnp.sqrt(deg)
    return d_inv_sqrt[:, None] * a_hat * d_inv_sqrt[None, :]


def init_gcn_params(key, in_feats, n_hidden, n_classes, n_layers):
    """Deterministic Glorot-style init for each GCNConv layer (W, b)."""
    dims = [in_feats] + [n_hidden] * (n_layers - 1) + [n_classes]
    params = []
    for i in range(n_layers):
        key, wk = jax.random.split(key)
        fan_in, fan_out = dims[i], dims[i + 1]
        scale = jnp.sqrt(6.0 / (fan_in + fan_out))
        w = jax.random.uniform(wk, (fan_in, fan_out), jnp.float32, -scale, scale)
        b = jnp.zeros((fan_out,), jnp.float32)
        params.append((w, b))
    return params


def _fused_vmem_bytes(n, feat_dims):
    """Rough resident-VMEM estimate for the fully fused kernel."""
    n_pad = round_up(max(n, 8), LANE)
    dims_pad = [round_up(d, LANE) for d in feat_dims]
    max_f = max(dims_pad)
    w_bytes = sum(2 * dims_pad[i] * dims_pad[i + 1] + 4 * dims_pad[i + 1]
                  for i in range(len(dims_pad) - 1))
    return (2 * n_pad * n_pad                # A_norm (bf16)
            + 2 * n_pad * dims_pad[0]        # X (bf16)
            + w_bytes                        # weights + biases
            + 4 * n_pad * dims_pad[-1]       # output (f32)
            + 3 * 4 * n_pad * max_f)         # f32 intermediates headroom


def gcn_forward(params, features, edge_index, *, force_tiled=False):
    n = features.shape[0]
    a_norm = build_normalized_adjacency(edge_index, n)
    x = features.astype(jnp.float32)
    n_classes = params[-1][0].shape[1]
    feat_dims = [features.shape[1]] + [w.shape[1] for (w, _) in params]
    if not force_tiled and _fused_vmem_bytes(n, feat_dims) <= FUSED_VMEM_BUDGET:
        return _fused_forward(a_norm, x, params, n_classes)
    # TODO(synk): a truly sparse (edge_index-driven) aggregation kernel for very
    # large graphs; the tiled path below still streams the dense N^2 A_norm.
    return _tiled_forward(a_norm, x, params, n_classes)


# TODO(synk): dropout is a constructor arg of the PyTorch module but is never
# applied in its forward(), so it is intentionally omitted here.


# ----------------------------------------------------------------------------
if __name__ == "__main__":
    key = jax.random.PRNGKey(0)

    num_nodes = 16
    num_edges = 40
    in_feats = 8
    n_hidden = 32
    n_classes = 4
    n_layers = 3
    dropout = 0.5  # unused in forward

    k_feat, k_edge, k_par = jax.random.split(key, 3)
    features = jax.random.normal(k_feat, (num_nodes, in_feats), jnp.float32)
    edge_index = jax.random.randint(k_edge, (2, num_edges), 0, num_nodes,
                                    dtype=jnp.int32)

    params = init_gcn_params(k_par, in_feats, n_hidden, n_classes, n_layers)

    # Pure-JAX f32 reference (same math as the PyTorch module's forward)
    def reference(params, features, edge_index):
        a = build_normalized_adjacency(edge_index, features.shape[0])
        h = features
        for (w, b) in params:
            h = jnp.maximum(a @ (h @ w) + b, 0.0)
        return jax.nn.log_softmax(h, axis=-1)

    ref = reference(params, features, edge_index)

    # fused (single pallas_call) path
    out = jax.block_until_ready(gcn_forward(params, features, edge_index))
    assert out.shape == (num_nodes, n_classes)
    assert bool(jnp.allclose(jnp.sum(jnp.exp(out), axis=-1), 1.0, atol=1e-4))
    assert bool(jnp.allclose(out, ref, atol=1e-1)), "fused path mismatch"

    # tiled (large-N) path, exercised on the same graph
    out_t = jax.block_until_ready(
        gcn_forward(params, features, edge_index, force_tiled=True))
    assert out_t.shape == (num_nodes, n_classes)
    assert bool(jnp.allclose(out_t, ref, atol=1e-1)), "tiled path mismatch"

    print("KERNEL_OK")
</pallas_src>

<mosaic_0001>
module attributes {stable_mosaic.version = 11 : i64} {
  func.func @kernel(%arg0: memref<128x128xbf16, #tpu.memory_space<vmem>>, %arg1: memref<128x128xbf16, #tpu.memory_space<vmem>>, %arg2: memref<128x128xbf16, #tpu.memory_space<vmem>>, %arg3: memref<1x128xf32, #tpu.memory_space<vmem>>, %arg4: memref<128x128xbf16, #tpu.memory_space<vmem>>, %arg5: memref<1x128xf32, #tpu.memory_space<vmem>>, %arg6: memref<128x128xbf16, #tpu.memory_space<vmem>>, %arg7: memref<1x128xf32, #tpu.memory_space<vmem>>, %arg8: memref<128x128xf32, #tpu.memory_space<vmem>>) attributes {dimension_semantics = [], scalar_prefetch = 0 : i64, scratch_operands = 0 : i64, tpu.core_type = #tpu.core_type<tc>} {
    %c0 = arith.constant 0 : index
    %c0_0 = arith.constant 0 : index
    %0 = vector.load %arg0[%c0, %c0_0] : memref<128x128xbf16, #tpu.memory_space<vmem>>, vector<128x128xbf16>
    %c0_1 = arith.constant 0 : index
    %c0_2 = arith.constant 0 : index
    %1 = vector.load %arg1[%c0_1, %c0_2] : memref<128x128xbf16, #tpu.memory_space<vmem>>, vector<128x128xbf16>
    %c0_3 = arith.constant 0 : index
    %c0_4 = arith.constant 0 : index
    %2 = vector.load %arg2[%c0_3, %c0_4] : memref<128x128xbf16, #tpu.memory_space<vmem>>, vector<128x128xbf16>
    %c0_5 = arith.constant 0 : index
    %c0_6 = arith.constant 0 : index
    %3 = vector.load %arg3[%c0_5, %c0_6] : memref<1x128xf32, #tpu.memory_space<vmem>>, vector<1x128xf32>
    %cst = arith.constant dense<0.000000e+00> : vector<128x128xf32>
    %4 = tpu.matmul %1, %2, %cst {dimension_numbers = #tpu.dot_dimension_numbers<[1], [0], [0], [1], [0, 0, 1, 1], [], []>} : vector<128x128xbf16>, vector<128x128xbf16>, vector<128x128xf32> -> vector<128x128xf32>
    %5 = arith.truncf %4 : vector<128x128xf32> to vector<128x128xbf16>
    %cst_7 = arith.constant dense<0.000000e+00> : vector<128x128xf32>
    %6 = tpu.matmul %0, %5, %cst_7 {dimension_numbers = #tpu.dot_dimension_numbers<[1], [0], [0], [1], [0, 0, 1, 1], [], []>} : vector<128x128xbf16>, vector<128x128xbf16>, vector<128x128xf32> -> vector<128x128xf32>
    %7 = vector.broadcast %3 : vector<1x128xf32> to vector<128x128xf32>
    %8 = arith.addf %6, %7 : vector<128x128xf32>
    %cst_8 = arith.constant 0.000000e+00 : f32
    %9 = vector.broadcast %cst_8 : f32 to vector<128x128xf32>
    %10 = arith.maximumf %8, %9 : vector<128x128xf32>
    %11 = arith.truncf %10 : vector<128x128xf32> to vector<128x128xbf16>
    %c0_9 = arith.constant 0 : index
    %c0_10 = arith.constant 0 : index
    %12 = vector.load %arg4[%c0_9, %c0_10] : memref<128x128xbf16, #tpu.memory_space<vmem>>, vector<128x128xbf16>
    %c0_11 = arith.constant 0 : index
    %c0_12 = arith.constant 0 : index
    %13 = vector.load %arg5[%c0_11, %c0_12] : memref<1x128xf32, #tpu.memory_space<vmem>>, vector<1x128xf32>
    %cst_13 = arith.constant dense<0.000000e+00> : vector<128x128xf32>
    %14 = tpu.matmul %11, %12, %cst_13 {dimension_numbers = #tpu.dot_dimension_numbers<[1], [0], [0], [1], [0, 0, 1, 1], [], []>} : vector<128x128xbf16>, vector<128x128xbf16>, vector<128x128xf32> -> vector<128x128xf32>
    %15 = arith.truncf %14 : vector<128x128xf32> to vector<128x128xbf16>
    %cst_14 = arith.constant dense<0.000000e+00> : vector<128x128xf32>
    %16 = tpu.matmul %0, %15, %cst_14 {dimension_numbers = #tpu.dot_dimension_numbers<[1], [0], [0], [1], [0, 0, 1, 1], [], []>} : vector<128x128xbf16>, vector<128x128xbf16>, vector<128x128xf32> -> vector<128x128xf32>
    %17 = vector.broadcast %13 : vector<1x128xf32> to vector<128x128xf32>
    %18 = arith.addf %16, %17 : vector<128x128xf32>
    %cst_15 = arith.constant 0.000000e+00 : f32
    %19 = vector.broadcast %cst_15 : f32 to vector<128x128xf32>
    %20 = arith.maximumf %18, %19 : vector<128x128xf32>
    %21 = arith.truncf %20 : vector<128x128xf32> to vector<128x128xbf16>
    %c0_16 = arith.constant 0 : index
    %c0_17 = arith.constant 0 : index
    %22 = vector.load %arg6[%c0_16, %c0_17] : memref<128x128xbf16, #tpu.memory_space<vmem>>, vector<128x128xbf16>
    %c0_18 = arith.constant 0 : index
    %c0_19 = arith.constant 0 : index
    %23 = vector.load %arg7[%c0_18, %c0_19] : memref<1x128xf32, #tpu.memory_space<vmem>>, vector<1x128xf32>
    %cst_20 = arith.constant dense<0.000000e+00> : vector<128x128xf32>
    %24 = tpu.matmul %21, %22, %cst_20 {dimension_numbers = #tpu.dot_dimension_numbers<[1], [0], [0], [1], [0, 0, 1, 1], [], []>} : vector<128x128xbf16>, vector<128x128xbf16>, vector<128x128xf32> -> vector<128x128xf32>
    %25 = arith.truncf %24 : vector<128x128xf32> to vector<128x128xbf16>
    %cst_21 = arith.constant dense<0.000000e+00> : vector<128x128xf32>
    %26 = tpu.matmul %0, %25, %cst_21 {dimension_numbers = #tpu.dot_dimension_numbers<[1], [0], [0], [1], [0, 0, 1, 1], [], []>} : vector<128x128xbf16>, vector<128x128xbf16>, vector<128x128xf32> -> vector<128x128xf32>
    %27 = vector.broadcast %23 : vector<1x128xf32> to vector<128x128xf32>
    %28 = arith.addf %26, %27 : vector<128x128xf32>
    %cst_22 = arith.constant 0.000000e+00 : f32
    %29 = vector.broadcast %cst_22 : f32 to vector<128x128xf32>
    %30 = arith.maximumf %28, %29 : vector<128x128xf32>
    %31 = tpu.iota {dimensions = array<i32: 1>} : vector<128x128xi32>
    %c4_i32 = arith.constant 4 : i32
    %32 = vector.broadcast %c4_i32 : i32 to vector<128x128xi32>
    %33 = arith.cmpi slt, %31, %32 : vector<128x128xi32>
    %cst_23 = arith.constant 0xFF800000 : f32
    %34 = vector.broadcast %cst_23 : f32 to vector<128x128xf32>
    %35 = arith.select %33, %30, %34 : vector<128x128xi1>, vector<128x128xf32>
    %cst_24 = arith.constant dense<0xFF800000> : vector<128xf32>
    %36 = vector.multi_reduction <maximumf>, %35, %cst_24 [1] : vector<128x128xf32> to vector<128xf32>
    %37 = vector.shape_cast %36 : vector<128xf32> to vector<128x1xf32>
    %38 = vector.broadcast %37 : vector<128x1xf32> to vector<128x128xf32>
    %39 = arith.subf %35, %38 : vector<128x128xf32>
    %40 = math.exp %39 : vector<128x128xf32>
    %cst_25 = arith.constant 0.000000e+00 : f32
    %41 = vector.broadcast %cst_25 : f32 to vector<128x128xf32>
    %42 = arith.select %33, %40, %41 : vector<128x128xi1>, vector<128x128xf32>
    %cst_26 = arith.constant dense<0.000000e+00> : vector<128xf32>
    %43 = vector.multi_reduction <add>, %42, %cst_26 [1] : vector<128x128xf32> to vector<128xf32>
    %44 = vector.shape_cast %43 : vector<128xf32> to vector<128x1xf32>
    %45 = math.log %44 : vector<128x1xf32>
    %46 = vector.broadcast %45 : vector<128x1xf32> to vector<128x128xf32>
    %47 = arith.subf %39, %46 : vector<128x128xf32>
    %c0_27 = arith.constant 0 : index
    %c0_28 = arith.constant 0 : index
    %48 = vector.load %arg8[%c0_27, %c0_28] : memref<128x128xf32, #tpu.memory_space<vmem>>, vector<128x128xf32>
    tpu.vector_store %arg8[%c0_27, %c0_28], %47 {strides = array<i32>} : memref<128x128xf32, #tpu.memory_space<vmem>>, vector<128x128xf32>,
    return
  }
}

</mosaic_0001>

<bundles_post_ra>
// kernel: tpu_custom_call.1
= control target key start
LH: loop header
LB: loop body
LE: loop exit
PB: predicated region body
PF: predicated region fallthrough
CT: control target
= control target key end

     0   :  { %13 = vsyncpa [#allocation3], 0  ;;  %s2259_s0 = inlined_call_operand.hbm [shape: bf16[128,128], index: 0, kind: input, shape index: {}]   ;;  %s2260_s1 = inlined_call_operand.hbm [shape: bf16[128,128], index: 1, kind: input, shape index: {}]   ;;  %s2261_s2 = inlined_call_operand.hbm [shape: bf16[128,128], index: 2, kind: input, shape index: {}]   ;;  %s2262_s3 = inlined_call_operand.vmem [shape: f32[1,128], index: 3, kind: input, shape index: {}]   ;;  %s2263_s4 = inlined_call_operand.hbm [shape: bf16[128,128], index: 4, kind: input, shape index: {}]   ;;  %s2264_s5 = inlined_call_operand.vmem [shape: f32[1,128], index: 5, kind: input, shape index: {}]   ;;  %s2265_s6 = inlined_call_operand.hbm [shape: bf16[128,128], index: 6, kind: input, shape index: {}]   ;;  %s2266_s7 = inlined_call_operand.vmem [shape: f32[1,128], index: 7, kind: input, shape index: {}]   ;;  %s2267_s8 = inlined_call_operand.hbm [shape: f32[128,128], index: 8, kind: output, shape index: {}]  }
   0x1   :  { %14 = vsyncpa [#allocation6], 0 }
   0x2   :  { %15 = vsyncpa [#allocation9], 0 }
   0x3   :  { %16 = vsyncpa [#allocation4], 0  ;;  %s1913_s27 = smov [#allocation5]   ;;  %s1914_s29 = smov [#allocation8]  }
   0x4   :  { %s34_s28 = sshll.u32 %s1913_s27, 4  ;;  %s60_s30 = sshll.u32 %s1914_s29, 4  ;;  %s35_s28 = int_to_ptr.vmem [resolvable:$true] %s34_s28  ;;  %s61_s30 = int_to_ptr.vmem [resolvable:$true] %s60_s30 }
   0x5   :  { %s1793_s9 = scalar_lea.vmem %s35_s28, 1024  ;;  %p1798_p1 = scmp.lt.s32.totalorder %s35_s28, %s35_s28 }
   0x6   :  { %p1794_p0 = scmp.ne.s32.totalorder %s35_s28, %s1793_s9  ;;  %p1799_p2 = scmp.lt.s32.totalorder %s1793_s9, %s1793_s9 }
   0x8   :  { %p1800_p3 = por %p1799_p2, %p1798_p1 }
   0xa   :  { %p1801_p4 = pnand %p1800_p3, %p1794_p0 }
   0xc   :  { %1804 = shalt.err (!%p1801_p4)
}
   0xd   :  { %s1915_s10 = smov 64   ;;  %s1916_s11 = smov 4  }
   0xe   :  { %40 = dma.hbm_to_vmem [thread:$0]  %s2260_s1, 1024, %s35_s28, [#allocation6], %s1915_s10, %s1915_s10, %s1916_s11  }
   0xf   :  { %s1813_s14 = scalar_lea.vmem %s61_s30, 1024  ;;  %p1818_p6 = scmp.lt.s32.totalorder %s61_s30, %s61_s30 }
  0x10   :  { %p1814_p5 = scmp.ne.s32.totalorder %s61_s30, %s1813_s14  ;;  %p1819_p7 = scmp.lt.s32.totalorder %s1813_s14, %s1813_s14 }
  0x12   :  { %p1820_p8 = por %p1819_p7, %p1818_p6 }
  0x14   :  { %p1821_p9 = pnand %p1820_p8, %p1814_p5 }
  0x16   :  { %1824 = shalt.err (!%p1821_p9)
}
  0x17   :  { %66 = dma.hbm_to_vmem [thread:$0]  %s2263_s4, 1024, %s61_s30, [#allocation9], %s1915_s10, %s1915_s10, %s1916_s11  }
  0x18   :  { %s1917_s17 = smov [#allocation2]   ;;  %s1918_s19 = smov [#allocation7]  }
  0x19   :  { %s22_s18 = sshll.u32 %s1917_s17, 4  ;;  %s46_s20 = sshll.u32 %s1918_s19, 4  ;;  %s23_s18 = int_to_ptr.vmem [resolvable:$true] %s22_s18  ;;  %s47_s20 = int_to_ptr.vmem [resolvable:$true] %s46_s20 }
  0x1a   :  { %s1833_s1 = scalar_lea.vmem %s23_s18, 1024  ;;  %p1838_p11 = scmp.lt.s32.totalorder %s23_s18, %s23_s18 }
  0x1b   :  { %p1834_p10 = scmp.ne.s32.totalorder %s23_s18, %s1833_s1  ;;  %p1839_p12 = scmp.lt.s32.totalorder %s1833_s1, %s1833_s1 }
  0x1d   :  { %p1840_p13 = por %p1839_p12, %p1838_p11 }
  0x1f   :  { %p1841_p0 = pnand %p1840_p13, %p1834_p10 }
  0x21   :  { %1844 = shalt.err (!%p1841_p0)
}
  0x22   :  { %28 = dma.hbm_to_vmem [thread:$0]  %s2259_s0, 1024, %s23_s18, [#allocation3], %s1915_s10, %s1915_s10, %s1916_s11  }
  0x23   :  { %s1853_s4 = scalar_lea.vmem %s47_s20, 1024  ;;  %p1858_p2 = scmp.lt.s32.totalorder %s47_s20, %s47_s20 }
  0x24   :  { %p1854_p1 = scmp.ne.s32.totalorder %s47_s20, %s1853_s4  ;;  %p1859_p3 = scmp.lt.s32.totalorder %s1853_s4, %s1853_s4 }
  0x26   :  { %p1860_p4 = por %p1859_p3, %p1858_p2 }
  0x28   :  { %p1861_p5 = pnand %p1860_p4, %p1854_p1 }
  0x2a   :  { %1864 = shalt.err (!%p1861_p5)
}
  0x2b   :  { %52 = dma.hbm_to_vmem [thread:$0]  %s2261_s2, 1024, %s47_s20, [#allocation6], %s1915_s10, %s1915_s10, %s1916_s11  }
  0x2c   :  { %s1919_s25 = smov [#allocation10]  }
  0x2d   :  { %s74_s26 = sshll.u32 %s1919_s25, 4  ;;  %s75_s26 = int_to_ptr.vmem [resolvable:$true] %s74_s26 }
  0x2e   :  { %s1873_s27 = scalar_lea.vmem %s75_s26, 1024  ;;  %p1878_p7 = scmp.lt.s32.totalorder %s75_s26, %s75_s26 }
  0x2f   :  { %p1874_p6 = scmp.ne.s32.totalorder %s75_s26, %s1873_s27  ;;  %p1879_p8 = scmp.lt.s32.totalorder %s1873_s27, %s1873_s27 }
  0x31   :  { %p1880_p9 = por %p1879_p8, %p1878_p7 }
  0x33   :  { %p1881_p10 = pnand %p1880_p9, %p1874_p6 }
  0x35   :  { %1884 = shalt.err (!%p1881_p10)
}
  0x36   :  { %80 = dma.hbm_to_vmem [thread:$0]  %s2265_s6, 1024, %s75_s26, [#allocation9], %s1915_s10, %s1915_s10, %s1916_s11  }
  0x37   :  { %1905 = dma.done.wait [#allocation3], 1024  }
  0x38   :  { %1906 = vsyncadd [#allocation3], 4294966272 }
  0x39   :  { %1907 = dma.done.wait [#allocation6], 2048  }
  0x3a   :  { %1908 = vsyncadd [#allocation6], 4294965248 }
  0x3b   :  { %1909 = dma.done.wait [#allocation9], 2048  }
  0x3c   :  { %1910 = vsyncadd [#allocation9], 4294965248  ;;  %v1681_v0 = vld [vmem:[#allocation7 + $0x38] sm:$0xff]   ;;  %v1682_v1 = vld [vmem:[#allocation7 + $0x30] sm:$0xff]  }
  0x3d   :  { %1479 = vmatprep.subr.bf16.mxu0 %v1681_v0  ;;  %v1683_v2 = vld [vmem:[#allocation7 + $0x28] sm:$0xff]   ;;  %v1684_v3 = vld [vmem:[#allocation7 + $0x20] sm:$0xff]   ;;  %v1685_v5 = vld [vmem:[#allocation7 + $0x18] sm:$0xff]  }
  0x3e   :  { %1480 = vmatpush3.bf16.msra.mxu0 %v1681_v0  ;;  %v1689_v4 = vld [vmem:[#allocation5] sm:$0xff]   ;;  %v1686_v6 = vld [vmem:[#allocation7 + $0x10] sm:$0xff]   ;;  %v1687_v7 = vld [vmem:[#allocation7 + $0x8] sm:$0xff]  }
  0x3f   :  { %1481 = vmatprep.subr.bf16.mxu0 %v1682_v1  ;;  %1495 = vmatprep.mubr.bf16.mxu0 %v1689_v4  ;;  %v1688_v8 = vld [vmem:[#allocation7] sm:$0xff]   ;;  %v1690_v9 = vld [vmem:[#allocation5 + $0x8] sm:$0xff]   ;;  %v1691_v10 = vld [vmem:[#allocation5 + $0x10] sm:$0xff]  }
  0x40   :  { %v1692_v11 = vld [vmem:[#allocation5 + $0x18] sm:$0xff]   ;;  %v1693_v12 = vld [vmem:[#allocation5 + $0x20] sm:$0xff]   ;;  %v1694_v13 = vld [vmem:[#allocation5 + $0x28] sm:$0xff]  }
  0x41   :  { %v1695_v14 = vld [vmem:[#allocation5 + $0x30] sm:$0xff]   ;;  %v1696_v15 = vld [vmem:[#allocation5 + $0x38] sm:$0xff]   ;;  %v1998_v16 = vld [vmem:[#allocation2] sm:$0xff]  }
  0x42   :  { %1482 = vmatpush3.bf16.msra.mxu0 %v1682_v1  ;;  %1527 = vmatprep.mubr.bf16.mxu1 %v1998_v16  ;;  %v1705_v17 = vld [vmem:[#allocation8 + $0x38] sm:$0xff]   ;;  %v1706_v18 = vld [vmem:[#allocation8 + $0x30] sm:$0xff]   ;;  %v1707_v19 = vld [vmem:[#allocation8 + $0x28] sm:$0xff]  }
  0x43   :  { %1483 = vmatprep.subr.bf16.mxu0 %v1683_v2  ;;  %v1708_v20 = vld [vmem:[#allocation8 + $0x20] sm:$0xff]   ;;  %v1709_v21 = vld [vmem:[#allocation8 + $0x18] sm:$0xff]   ;;  %v2001_v46 = vld [vmem:[#allocation2 + $0x8] sm:$0xff]  }
  0x44   :  { %v2003_v47 = vld [vmem:[#allocation2 + $0x10] sm:$0xff]   ;;  %v2007_v48 = vld [vmem:[#allocation2 + $0x18] sm:$0xff]   ;;  %v2009_v49 = vld [vmem:[#allocation2 + $0x20] sm:$0xff]  }
  0x45   :  { %v2013_v50 = vld [vmem:[#allocation2 + $0x28] sm:$0xff]   ;;  %v2015_v51 = vld [vmem:[#allocation2 + $0x30] sm:$0xff]   ;;  %v2019_v52 = vld [vmem:[#allocation2 + $0x38] sm:$0xff]  }
  0x46   :  { %1484 = vmatpush3.bf16.msra.mxu0 %v1683_v2  ;;  %v1710_v53 = vld [vmem:[#allocation8 + $0x10] sm:$0xff]   ;;  %v1711_v54 = vld [vmem:[#allocation8 + $0x8] sm:$0xff]   ;;  %v1712_v55 = vld [vmem:[#allocation8] sm:$0xff]  }
  0x47   :  { %1485 = vmatprep.subr.bf16.mxu0 %v1684_v3  ;;  %v1356_v58 = vld [vmem:[%s2262_s3] ss:$0 sm:$0xff] }
  0x4a   :  { %1486 = vmatpush3.bf16.msra.mxu0 %v1684_v3 }
  0x4b   :  { %1487 = vmatprep.subr.bf16.mxu0 %v1685_v5 }
  0x4e   :  { %1488 = vmatpush3.bf16.msra.mxu0 %v1685_v5 }
  0x4f   :  { %1489 = vmatprep.subr.bf16.mxu0 %v1686_v6 }
  0x52   :  { %1490 = vmatpush3.bf16.msra.mxu0 %v1686_v6 }
  0x53   :  { %1491 = vmatprep.subr.bf16.mxu0 %v1687_v7 }
  0x56   :  { %1492 = vmatpush3.bf16.msra.mxu0 %v1687_v7 }
  0x57   :  { %1493 = vmatprep.subr.bf16.mxu0 %v1688_v8 }
  0x5a   :  { %1494 = vmatpush3.bf16.msra.mxu0 %v1688_v8 }
  0x5b   :  { %1543 = vmatprep.subr.bf16.mxu0 %v1705_v17 }
  0x5d   :  { %1496 = vmatmul.mubr.bf16.vlgmr.msra.gmra.mxu0 %v1690_v9 }
  0x5e   :  { %1499 = vmatprep.mubr.bf16.mxu0 %v1691_v10  ;;  %1544 = vmatpush3.bf16.msra.mxu0 %v1705_v17 }
  0x5f   :  { %1545 = vmatprep.subr.bf16.mxu0 %v1706_v18 }
  0x62   :  { %1546 = vmatpush3.bf16.msra.mxu0 %v1706_v18 }
  0x63   :  { %1547 = vmatprep.subr.bf16.mxu0 %v1707_v19 }
  0x65   :  { %1500 = vmatmul.mubr.bf16.gmra.mxu0 %v1692_v11 }
  0x66   :  { %1503 = vmatprep.mubr.bf16.mxu0 %v1693_v12  ;;  %1548 = vmatpush3.bf16.msra.mxu0 %v1707_v19 }
  0x67   :  { %1549 = vmatprep.subr.bf16.mxu0 %v1708_v20 }
  0x6a   :  { %1550 = vmatpush3.bf16.msra.mxu0 %v1708_v20 }
  0x6b   :  { %1551 = vmatprep.subr.bf16.mxu0 %v1709_v21 }
  0x6d   :  { %1504 = vmatmul.mubr.bf16.gmra.mxu0 %v1694_v13 }
  0x6e   :  { %1507 = vmatprep.mubr.bf16.mxu0 %v1695_v14  ;;  %1552 = vmatpush3.bf16.msra.mxu0 %v1709_v21 }
  0x6f   :  { %1553 = vmatprep.subr.bf16.mxu0 %v1710_v53 }
  0x72   :  { %1554 = vmatpush3.bf16.msra.mxu0 %v1710_v53 }
  0x73   :  { %1555 = vmatprep.subr.bf16.mxu0 %v1711_v54 }
  0x75   :  { %1508 = vmatmul.mubr.bf16.gmra.mxu0 %v1696_v15 }
  0x76   :  { %1556 = vmatpush3.bf16.msra.mxu0 %v1711_v54 }
  0x77   :  { %1557 = vmatprep.subr.bf16.mxu0 %v1712_v55 }
  0x7a   :  { %1558 = vmatpush3.bf16.msra.mxu0 %v1712_v55 }
 0x11d   :  { %v1497_v22 = vpop.f32.mrf.mxu0 }
 0x11f   :  { %v278_v23 = vpop.f32.mrf.mxu0 }
 0x121   :  { %v1498_v24 = vpop.f32.mrf.mxu0 }
 0x122   :  { %v342_v44 = vpack.c.bf16 %v1498_v24, %v1497_v22 }
 0x123   :  { %v281_v25 = vpop.f32.mrf.mxu0 }
 0x124   :  { %v341_v45 = vpack.c.bf16 %v281_v25, %v278_v23 }
 0x125   :  { %v1501_v26 = vpop.f32.mrf.mxu0 }
 0x127   :  { %v294_v27 = vpop.f32.mrf.mxu0 }
 0x129   :  { %v1502_v28 = vpop.f32.mrf.mxu0 }
 0x12a   :  { %v344_v42 = vpack.c.bf16 %v1502_v28, %v1501_v26 }
 0x12b   :  { %v297_v29 = vpop.f32.mrf.mxu0 }
 0x12c   :  { %v343_v43 = vpack.c.bf16 %v297_v29, %v294_v27 }
 0x12d   :  { %v1505_v30 = vpop.f32.mrf.mxu0 }
 0x12f   :  { %v310_v31 = vpop.f32.mrf.mxu0 }
 0x131   :  { %v1506_v32 = vpop.f32.mrf.mxu0 }
 0x132   :  { %v346_v40 = vpack.c.bf16 %v1506_v32, %v1505_v30 }
 0x133   :  { %v313_v33 = vpop.f32.mrf.mxu0 }
 0x134   :  { %v345_v41 = vpack.c.bf16 %v313_v33, %v310_v31 }
 0x135   :  { %v1509_v34 = vpop.f32.mrf.mxu0 }
 0x137   :  { %v326_v35 = vpop.f32.mrf.mxu0 }
 0x139   :  { %v1510_v36 = vpop.f32.mrf.mxu0 }
 0x13a   :  { %v348_v37 = vpack.c.bf16 %v1510_v36, %v1509_v34 }
 0x13b   :  { %v329_v38 = vpop.f32.mrf.mxu0 }
 0x13c   :  { %v347_v39 = vpack.c.bf16 %v329_v38, %v326_v35  ;;  %1511 = vmatprep.subr.bf16.mxu1 %v348_v37 }
 0x13d   :  { %1512 = vmatpush3.bf16.msra.mxu1 %v348_v37 }
 0x13e   :  { %1513 = vmatprep.subr.bf16.mxu1 %v347_v39 }
 0x141   :  { %1514 = vmatpush3.bf16.msra.mxu1 %v347_v39 }
 0x142   :  { %1515 = vmatprep.subr.bf16.mxu1 %v346_v40 }
 0x145   :  { %1516 = vmatpush3.bf16.msra.mxu1 %v346_v40 }
 0x146   :  { %1517 = vmatprep.subr.bf16.mxu1 %v345_v41 }
 0x149   :  { %1518 = vmatpush3.bf16.msra.mxu1 %v345_v41 }
 0x14a   :  { %1519 = vmatprep.subr.bf16.mxu1 %v344_v42 }
 0x14d   :  { %1520 = vmatpush3.bf16.msra.mxu1 %v344_v42 }
 0x14e   :  { %1521 = vmatprep.subr.bf16.mxu1 %v343_v43 }
 0x151   :  { %1522 = vmatpush3.bf16.msra.mxu1 %v343_v43 }
 0x152   :  { %1523 = vmatprep.subr.bf16.mxu1 %v342_v44 }
 0x155   :  { %1524 = vmatpush3.bf16.msra.mxu1 %v342_v44 }
 0x156   :  { %1525 = vmatprep.subr.bf16.mxu1 %v341_v45 }
 0x159   :  { %1526 = vmatpush3.bf16.msra.mxu1 %v341_v45 }
 0x15c   :  { %1528 = vmatmul.mubr.bf16.vlgmr.msra.gmra.mxu1 %v2001_v46 }
 0x15d   :  { %1531 = vmatprep.mubr.bf16.mxu1 %v2003_v47 }
 0x164   :  { %1532 = vmatmul.mubr.bf16.gmra.mxu1 %v2007_v48 }
 0x165   :  { %1535 = vmatprep.mubr.bf16.mxu1 %v2009_v49 }
 0x16c   :  { %1536 = vmatmul.mubr.bf16.gmra.mxu1 %v2013_v50 }
 0x16d   :  { %1539 = vmatprep.mubr.bf16.mxu1 %v2015_v51 }
 0x174   :  { %1540 = vmatmul.mubr.bf16.gmra.mxu1 %v2019_v52 }
 0x175   :  { %1591 = vmatprep.mubr.bf16.mxu1 %v1998_v16 }
 0x21c   :  { %v1529_v56 = vpop.f32.mrf.mxu1 }
 0x21d   :  { %v446_v62 = vadd.f32 %v1529_v56, %v1356_v58 }
 0x21e   :  { %v437_v57 = vpop.f32.mrf.mxu1 }
 0x21f   :  { %v438_v60 = vadd.f32 %v1356_v58, %v437_v57  ;;  %v502_v5 = vmax.f32 %v446_v62, 0.0  ;;  %v1713_v57 = vld [vmem:[#allocation10 + $0x38] sm:$0xff]  }
 0x220   :  { %v1530_v59 = vpop.f32.mrf.mxu1  ;;  %1607 = vmatprep.subr.bf16.mxu0 %v1713_v57 }
 0x221   :  { %v449_v61 = vadd.f32 %v1530_v59, %v1356_v58  ;;  %v500_v3 = vmax.f32 %v438_v60, 0.0  ;;  %v1714_v59 = vld [vmem:[#allocation10 + $0x30] sm:$0xff]   ;;  %v1715_v60 = vld [vmem:[#allocation10 + $0x28] sm:$0xff]  }
 0x222   :  { %v440_v63 = vpop.f32.mrf.mxu1 }
 0x223   :  { %v441_v0 = vadd.f32 %v1356_v58, %v440_v63  ;;  %v503_v1 = vmax.f32 %v449_v61, 0.0  ;;  %v1716_v61 = vld [vmem:[#allocation10 + $0x20] sm:$0xff]  }
 0x224   :  { %v1533_v2 = vpop.f32.mrf.mxu1 }
 0x225   :  { %v501_v4 = vmax.f32 %v441_v0, 0.0  ;;  %v517_v8 = vpack.c.bf16 %v503_v1, %v502_v5  ;;  %v462_v12 = vadd.f32 %v1533_v2, %v1356_v58 }
 0x226   :  { %v453_v6 = vpop.f32.mrf.mxu1 }
 0x227   :  { %v516_v7 = vpack.c.bf16 %v501_v4, %v500_v3  ;;  %v454_v10 = vadd.f32 %v1356_v58, %v453_v6  ;;  %v506_v20 = vmax.f32 %v462_v12, 0.0 }
 0x228   :  { %v1534_v9 = vpop.f32.mrf.mxu1 }
 0x229   :  { %v465_v11 = vadd.f32 %v1534_v9, %v1356_v58  ;;  %1559 = vmatprep.mubr.bf16.mxu0 %v516_v7  ;;  %v504_v18 = vmax.f32 %v454_v10, 0.0 }
 0x22a   :  { %v456_v13 = vpop.f32.mrf.mxu1  ;;  %1560 = vmatmul.mubr.bf16.vlgmr.msra.gmra.mxu0 %v517_v8 }
 0x22b   :  { %v457_v14 = vadd.f32 %v1356_v58, %v456_v13  ;;  %v507_v15 = vmax.f32 %v465_v11, 0.0  ;;  %1608 = vmatpush3.bf16.msra.mxu0 %v1713_v57 }
 0x22c   :  { %v1537_v17 = vpop.f32.mrf.mxu1  ;;  %1609 = vmatprep.subr.bf16.mxu0 %v1714_v59 }
 0x22d   :  { %v505_v19 = vmax.f32 %v457_v14, 0.0  ;;  %v519_v23 = vpack.c.bf16 %v507_v15, %v506_v20  ;;  %v478_v27 = vadd.f32 %v1537_v17, %v1356_v58 }
 0x22e   :  { %v469_v21 = vpop.f32.mrf.mxu1 }
 0x22f   :  { %v518_v22 = vpack.c.bf16 %v505_v19, %v504_v18  ;;  %v470_v25 = vadd.f32 %v1356_v58, %v469_v21  ;;  %v510_v34 = vmax.f32 %v478_v27, 0.0  ;;  %1610 = vmatpush3.bf16.msra.mxu0 %v1714_v59 }
 0x230   :  { %v1538_v24 = vpop.f32.mrf.mxu1  ;;  %1611 = vmatprep.subr.bf16.mxu0 %v1715_v60 }
 0x231   :  { %v481_v26 = vadd.f32 %v1538_v24, %v1356_v58  ;;  %1563 = vmatprep.mubr.bf16.mxu0 %v518_v22  ;;  %v508_v32 = vmax.f32 %v470_v25, 0.0  ;;  %v1719_v24 = vld [vmem:[#allocation10 + $0x8] sm:$0xff]   ;;  %v1720_v25 = vld [vmem:[#allocation10] sm:$0xff]  }
 0x232   :  { %v472_v28 = vpop.f32.mrf.mxu1  ;;  %1564 = vmatmul.mubr.bf16.gmra.mxu0 %v519_v23  ;;  %v1718_v23 = vld [vmem:[#allocation10 + $0x10] sm:$0xff]  }
 0x233   :  { %v473_v29 = vadd.f32 %v1356_v58, %v472_v28  ;;  %v511_v30 = vmax.f32 %v481_v26, 0.0  ;;  %1612 = vmatpush3.bf16.msra.mxu0 %v1715_v60  ;;  %v1373_v28 = vld [vmem:[%s2264_s5] ss:$0 sm:$0xff] }
 0x234   :  { %v1541_v31 = vpop.f32.mrf.mxu1  ;;  %1613 = vmatprep.subr.bf16.mxu0 %v1716_v61 }
 0x235   :  { %v509_v33 = vmax.f32 %v473_v29, 0.0  ;;  %v521_v37 = vpack.c.bf16 %v511_v30, %v510_v34  ;;  %v494_v41 = vadd.f32 %v1541_v31, %v1356_v58 }
 0x236   :  { %v485_v35 = vpop.f32.mrf.mxu1 }
 0x237   :  { %v520_v36 = vpack.c.bf16 %v509_v33, %v508_v32  ;;  %v486_v39 = vadd.f32 %v1356_v58, %v485_v35  ;;  %v514_v54 = vmax.f32 %v494_v41, 0.0  ;;  %1614 = vmatpush3.bf16.msra.mxu0 %v1716_v61 }
 0x238   :  { %v1542_v38 = vpop.f32.mrf.mxu1 }
 0x239   :  { %v497_v40 = vadd.f32 %v1542_v38, %v1356_v58  ;;  %1567 = vmatprep.mubr.bf16.mxu0 %v520_v36  ;;  %v512_v45 = vmax.f32 %v486_v39, 0.0 }
 0x23a   :  { %v488_v42 = vpop.f32.mrf.mxu1  ;;  %1568 = vmatmul.mubr.bf16.gmra.mxu0 %v521_v37 }
 0x23b   :  { %v489_v43 = vadd.f32 %v1356_v58, %v488_v42  ;;  %v515_v44 = vmax.f32 %v497_v40, 0.0  ;;  %v1717_v58 = vld [vmem:[#allocation10 + $0x18] sm:$0xff]  }
 0x23c   :  { %1615 = vmatprep.subr.bf16.mxu0 %v1717_v58 }
 0x23d   :  { %v513_v53 = vmax.f32 %v489_v43, 0.0  ;;  %v523_v56 = vpack.c.bf16 %v515_v44, %v514_v54  ;;  %1616 = vmatpush3.bf16.msra.mxu0 %v1717_v58 }
 0x23e   :  { %1617 = vmatprep.subr.bf16.mxu0 %v1718_v23 }
 0x23f   :  { %v522_v55 = vpack.c.bf16 %v513_v53, %v512_v45 }
 0x241   :  { %1571 = vmatprep.mubr.bf16.mxu0 %v522_v55  ;;  %1618 = vmatpush3.bf16.msra.mxu0 %v1718_v23 }
 0x242   :  { %1572 = vmatmul.mubr.bf16.gmra.mxu0 %v523_v56  ;;  %1619 = vmatprep.subr.bf16.mxu0 %v1719_v24 }
 0x245   :  { %1620 = vmatpush3.bf16.msra.mxu0 %v1719_v24 }
 0x246   :  { %1621 = vmatprep.subr.bf16.mxu0 %v1720_v25 }
 0x249   :  { %1622 = vmatpush3.bf16.msra.mxu0 %v1720_v25 }
 0x2ea   :  { %v1561_v62 = vpop.f32.mrf.mxu0 }
 0x2ec   :  { %v623_v63 = vpop.f32.mrf.mxu0 }
 0x2ee   :  { %v1562_v0 = vpop.f32.mrf.mxu0 }
 0x2ef   :  { %v687_v21 = vpack.c.bf16 %v1562_v0, %v1561_v62 }
 0x2f0   :  { %v626_v1 = vpop.f32.mrf.mxu0 }
 0x2f1   :  { %v686_v22 = vpack.c.bf16 %v626_v1, %v623_v63 }
 0x2f2   :  { %v1565_v2 = vpop.f32.mrf.mxu0 }
 0x2f4   :  { %v639_v3 = vpop.f32.mrf.mxu0 }
 0x2f6   :  { %v1566_v4 = vpop.f32.mrf.mxu0 }
 0x2f7   :  { %v689_v19 = vpack.c.bf16 %v1566_v4, %v1565_v2 }
 0x2f8   :  { %v642_v5 = vpop.f32.mrf.mxu0 }
 0x2f9   :  { %v688_v20 = vpack.c.bf16 %v642_v5, %v639_v3 }
 0x2fa   :  { %v1569_v6 = vpop.f32.mrf.mxu0 }
 0x2fc   :  { %v655_v7 = vpop.f32.mrf.mxu0 }
 0x2fe   :  { %v1570_v8 = vpop.f32.mrf.mxu0 }
 0x2ff   :  { %v691_v17 = vpack.c.bf16 %v1570_v8, %v1569_v6 }
 0x300   :  { %v658_v9 = vpop.f32.mrf.mxu0 }
 0x301   :  { %v690_v18 = vpack.c.bf16 %v658_v9, %v655_v7 }
 0x302   :  { %v1573_v10 = vpop.f32.mrf.mxu0 }
 0x304   :  { %v671_v11 = vpop.f32.mrf.mxu0 }
 0x306   :  { %v1574_v12 = vpop.f32.mrf.mxu0 }
 0x307   :  { %v693_v13 = vpack.c.bf16 %v1574_v12, %v1573_v10 }
 0x308   :  { %v674_v14 = vpop.f32.mrf.mxu0 }
 0x309   :  { %v692_v15 = vpack.c.bf16 %v674_v14, %v671_v11  ;;  %1575 = vmatprep.subr.bf16.mxu1 %v693_v13 }
 0x30a   :  { %1576 = vmatpush3.bf16.msra.mxu1 %v693_v13 }
 0x30b   :  { %1577 = vmatprep.subr.bf16.mxu1 %v692_v15 }
 0x30e   :  { %1578 = vmatpush3.bf16.msra.mxu1 %v692_v15 }
 0x30f   :  { %1579 = vmatprep.subr.bf16.mxu1 %v691_v17 }
 0x312   :  { %1580 = vmatpush3.bf16.msra.mxu1 %v691_v17 }
 0x313   :  { %1581 = vmatprep.subr.bf16.mxu1 %v690_v18 }
 0x316   :  { %1582 = vmatpush3.bf16.msra.mxu1 %v690_v18 }
 0x317   :  { %1583 = vmatprep.subr.bf16.mxu1 %v689_v19 }
 0x31a   :  { %1584 = vmatpush3.bf16.msra.mxu1 %v689_v19 }
 0x31b   :  { %1585 = vmatprep.subr.bf16.mxu1 %v688_v20 }
 0x31e   :  { %1586 = vmatpush3.bf16.msra.mxu1 %v688_v20 }
 0x31f   :  { %1587 = vmatprep.subr.bf16.mxu1 %v687_v21 }
 0x322   :  { %1588 = vmatpush3.bf16.msra.mxu1 %v687_v21 }
 0x323   :  { %1589 = vmatprep.subr.bf16.mxu1 %v686_v22 }
 0x326   :  { %1590 = vmatpush3.bf16.msra.mxu1 %v686_v22 }
 0x329   :  { %1592 = vmatmul.mubr.bf16.vlgmr.msra.gmra.mxu1 %v2001_v46 }
 0x32a   :  { %1595 = vmatprep.mubr.bf16.mxu1 %v2003_v47 }
 0x331   :  { %1596 = vmatmul.mubr.bf16.gmra.mxu1 %v2007_v48 }
 0x332   :  { %1599 = vmatprep.mubr.bf16.mxu1 %v2009_v49 }
 0x339   :  { %1600 = vmatmul.mubr.bf16.gmra.mxu1 %v2013_v50 }
 0x33a   :  { %1603 = vmatprep.mubr.bf16.mxu1 %v2015_v51 }
 0x341   :  { %1604 = vmatmul.mubr.bf16.gmra.mxu1 %v2019_v52 }
 0x342   :  { %1655 = vmatprep.mubr.bf16.mxu1 %v1998_v16 }
 0x3e9   :  { %v1593_v26 = vpop.f32.mrf.mxu1 }
 0x3ea   :  { %v743_v32 = vadd.f32 %v1593_v26, %v1373_v28 }
 0x3eb   :  { %v734_v27 = vpop.f32.mrf.mxu1 }
 0x3ec   :  { %v735_v30 = vadd.f32 %v1373_v28, %v734_v27  ;;  %v799_v38 = vmax.f32 %v743_v32, 0.0 }
 0x3ed   :  { %v1594_v29 = vpop.f32.mrf.mxu1 }
 0x3ee   :  { %v746_v31 = vadd.f32 %v1594_v29, %v1373_v28  ;;  %v797_v36 = vmax.f32 %v735_v30, 0.0 }
 0x3ef   :  { %v737_v16 = vpop.f32.mrf.mxu1 }
 0x3f0   :  { %v738_v33 = vadd.f32 %v1373_v28, %v737_v16  ;;  %v800_v34 = vmax.f32 %v746_v31, 0.0 }
 0x3f1   :  { %v1597_v35 = vpop.f32.mrf.mxu1 }
 0x3f2   :  { %v798_v37 = vmax.f32 %v738_v33, 0.0  ;;  %v814_v41 = vpack.c.bf16 %v800_v34, %v799_v38  ;;  %v759_v45 = vadd.f32 %v1597_v35, %v1373_v28 }
 0x3f3   :  { %v750_v39 = vpop.f32.mrf.mxu1 }
 0x3f4   :  { %v813_v40 = vpack.c.bf16 %v798_v37, %v797_v36  ;;  %v751_v43 = vadd.f32 %v1373_v28, %v750_v39  ;;  %v803_v60 = vmax.f32 %v759_v45, 0.0 }
 0x3f5   :  { %v1598_v42 = vpop.f32.mrf.mxu1 }
 0x3f6   :  { %v762_v44 = vadd.f32 %v1598_v42, %v1373_v28  ;;  %1623 = vmatprep.mubr.bf16.mxu0 %v813_v40  ;;  %v801_v57 = vmax.f32 %v751_v43, 0.0 }
 0x3f7   :  { %v753_v53 = vpop.f32.mrf.mxu1  ;;  %1624 = vmatmul.mubr.bf16.vlgmr.msra.gmra.mxu0 %v814_v41 }
 0x3f8   :  { %v754_v54 = vadd.f32 %v1373_v28, %v753_v53  ;;  %v804_v55 = vmax.f32 %v762_v44, 0.0 }
 0x3f9   :  { %v1601_v56 = vpop.f32.mrf.mxu1 }
 0x3fa   :  { %v802_v59 = vmax.f32 %v754_v54, 0.0  ;;  %v816_v62 = vpack.c.bf16 %v804_v55, %v803_v60  ;;  %v775_v2 = vadd.f32 %v1601_v56, %v1373_v28  ;;  %v1110_v56 = vlaneseq }
 0x3fb   :  { %v766_v61 = vpop.f32.mrf.mxu1 }
 0x3fc   :  { %v815_v58 = vpack.c.bf16 %v802_v59, %v801_v57  ;;  %v767_v0 = vadd.f32 %v1373_v28, %v766_v61  ;;  %v807_v9 = vmax.f32 %v775_v2, 0.0  ;;  %v2047_v57 = vld [vmem:[%s2266_s7] ss:$0 sm:$0xff]  ;;  %v2049_v59 = vand.u32 127, %v1110_v56  ;;  %s1920_s7 = smov [#allocation11]  }
 0x3fd   :  { %v1602_v63 = vpop.f32.mrf.mxu1  ;;  %s1326_s9 = sshll.u32 %s1920_s7, 4  ;;  %s1327_s9 = int_to_ptr.vmem [resolvable:$true] %s1326_s9 }
 0x3fe   :  { %v778_v1 = vadd.f32 %v1602_v63, %v1373_v28  ;;  %1627 = vmatprep.mubr.bf16.mxu0 %v815_v58  ;;  %v805_v7 = vmax.f32 %v767_v0, 0.0  ;;  %vm1112_vm0 = vcmp.lt.s32.totalorder %v2049_v59, 4  ;;  %s1885_s10 = scalar_lea.vmem %s1327_s9, 2048  ;;  %p1890_p12 = scmp.lt.s32.totalorder %s1327_s9, %s1327_s9 }
 0x3ff   :  { %v769_v3 = vpop.f32.mrf.mxu1  ;;  %1628 = vmatmul.mubr.bf16.gmra.mxu0 %v816_v62  ;;  %p1886_p11 = scmp.ne.s32.totalorder %s1327_s9, %s1885_s10  ;;  %p1891_p13 = scmp.lt.s32.totalorder %s1885_s10, %s1885_s10 }
 0x400   :  { %v770_v4 = vadd.f32 %v1373_v28, %v769_v3  ;;  %v808_v5 = vmax.f32 %v778_v1, 0.0 }
 0x401   :  { %v1605_v6 = vpop.f32.mrf.mxu1  ;;  %p1892_p0 = por %p1891_p13, %p1890_p12 }
 0x402   :  { %v806_v8 = vmax.f32 %v770_v4, 0.0  ;;  %v818_v12 = vpack.c.bf16 %v808_v5, %v807_v9  ;;  %v791_v17 = vadd.f32 %v1605_v6, %v1373_v28 }
 0x403   :  { %v782_v10 = vpop.f32.mrf.mxu1  ;;  %p1893_p1 = pnand %p1892_p0, %p1886_p11 }
 0x404   :  { %v817_v11 = vpack.c.bf16 %v806_v8, %v805_v7  ;;  %v783_v14 = vadd.f32 %v1373_v28, %v782_v10  ;;  %v811_v23 = vmax.f32 %v791_v17, 0.0 }
 0x405   :  { %v1606_v13 = vpop.f32.mrf.mxu1 }
 0x406   :  { %v794_v15 = vadd.f32 %v1606_v13, %v1373_v28  ;;  %1631 = vmatprep.mubr.bf16.mxu0 %v817_v11  ;;  %v809_v21 = vmax.f32 %v783_v14, 0.0 }
 0x407   :  { %v785_v18 = vpop.f32.mrf.mxu1  ;;  %1632 = vmatmul.mubr.bf16.gmra.mxu0 %v818_v12 }
 0x408   :  { %v786_v19 = vadd.f32 %v1373_v28, %v785_v18  ;;  %v812_v20 = vmax.f32 %v794_v15, 0.0 }
 0x40a   :  { %v810_v22 = vmax.f32 %v786_v19, 0.0  ;;  %v820_v25 = vpack.c.bf16 %v812_v20, %v811_v23 }
 0x40c   :  { %v819_v24 = vpack.c.bf16 %v810_v22, %v809_v21 }
 0x40e   :  { %1635 = vmatprep.mubr.bf16.mxu0 %v819_v24 }
 0x40f   :  { %1636 = vmatmul.mubr.bf16.gmra.mxu0 %v820_v25 }
 0x4b7   :  { %v1625_v26 = vpop.f32.mrf.mxu0 }
 0x4b9   :  { %v920_v27 = vpop.f32.mrf.mxu0 }
 0x4bb   :  { %v1626_v29 = vpop.f32.mrf.mxu0 }
 0x4bc   :  { %v984_v54 = vpack.c.bf16 %v1626_v29, %v1625_v26 }
 0x4bd   :  { %v923_v30 = vpop.f32.mrf.mxu0 }
 0x4be   :  { %v983_v55 = vpack.c.bf16 %v923_v30, %v920_v27 }
 0x4bf   :  { %v1629_v31 = vpop.f32.mrf.mxu0 }
 0x4c1   :  { %v936_v32 = vpop.f32.mrf.mxu0 }
 0x4c3   :  { %v1630_v16 = vpop.f32.mrf.mxu0 }
 0x4c4   :  { %v986_v45 = vpack.c.bf16 %v1630_v16, %v1629_v31 }
 0x4c5   :  { %v939_v33 = vpop.f32.mrf.mxu0 }
 0x4c6   :  { %v985_v53 = vpack.c.bf16 %v939_v33, %v936_v32 }
 0x4c7   :  { %v1633_v34 = vpop.f32.mrf.mxu0 }
 0x4c9   :  { %v952_v35 = vpop.f32.mrf.mxu0 }
 0x4cb   :  { %v1634_v36 = vpop.f32.mrf.mxu0 }
 0x4cc   :  { %v988_v43 = vpack.c.bf16 %v1634_v36, %v1633_v34 }
 0x4cd   :  { %v955_v28 = vpop.f32.mrf.mxu0 }
 0x4ce   :  { %v987_v44 = vpack.c.bf16 %v955_v28, %v952_v35 }
 0x4cf   :  { %v1637_v37 = vpop.f32.mrf.mxu0 }
 0x4d1   :  { %v968_v38 = vpop.f32.mrf.mxu0 }
 0x4d3   :  { %v1638_v39 = vpop.f32.mrf.mxu0 }
 0x4d4   :  { %v990_v40 = vpack.c.bf16 %v1638_v39, %v1637_v37 }
 0x4d5   :  { %v971_v41 = vpop.f32.mrf.mxu0 }
 0x4d6   :  { %v989_v42 = vpack.c.bf16 %v971_v41, %v968_v38  ;;  %1639 = vmatprep.subr.bf16.mxu1 %v990_v40 }
 0x4d7   :  { %1640 = vmatpush3.bf16.msra.mxu1 %v990_v40 }
 0x4d8   :  { %1641 = vmatprep.subr.bf16.mxu1 %v989_v42 }
 0x4db   :  { %1642 = vmatpush3.bf16.msra.mxu1 %v989_v42 }
 0x4dc   :  { %1643 = vmatprep.subr.bf16.mxu1 %v988_v43 }
 0x4df   :  { %1644 = vmatpush3.bf16.msra.mxu1 %v988_v43 }
 0x4e0   :  { %1645 = vmatprep.subr.bf16.mxu1 %v987_v44 }
 0x4e3   :  { %1646 = vmatpush3.bf16.msra.mxu1 %v987_v44 }
 0x4e4   :  { %1647 = vmatprep.subr.bf16.mxu1 %v986_v45 }
 0x4e7   :  { %1648 = vmatpush3.bf16.msra.mxu1 %v986_v45 }
 0x4e8   :  { %1649 = vmatprep.subr.bf16.mxu1 %v985_v53 }
 0x4eb   :  { %1650 = vmatpush3.bf16.msra.mxu1 %v985_v53 }
 0x4ec   :  { %1651 = vmatprep.subr.bf16.mxu1 %v984_v54 }
 0x4ef   :  { %1652 = vmatpush3.bf16.msra.mxu1 %v984_v54 }
 0x4f0   :  { %1653 = vmatprep.subr.bf16.mxu1 %v983_v55 }
 0x4f3   :  { %1654 = vmatpush3.bf16.msra.mxu1 %v983_v55 }
 0x4f6   :  { %1656 = vmatmul.mubr.bf16.vlgmr.msra.gmra.mxu1 %v2001_v46 }
 0x4f7   :  { %1659 = vmatprep.mubr.bf16.mxu1 %v2003_v47 }
 0x4fe   :  { %1660 = vmatmul.mubr.bf16.gmra.mxu1 %v2007_v48 }
 0x4ff   :  { %1663 = vmatprep.mubr.bf16.mxu1 %v2009_v49 }
 0x506   :  { %1664 = vmatmul.mubr.bf16.gmra.mxu1 %v2013_v50 }
 0x507   :  { %1667 = vmatprep.mubr.bf16.mxu1 %v2015_v51 }
 0x50e   :  { %1668 = vmatmul.mubr.bf16.gmra.mxu1 %v2019_v52 }
 0x5b6   :  { %v1657_v46 = vpop.f32.mrf.mxu1 }
 0x5b7   :  { %v1040_v47 = vadd.f32 %v1657_v46, %v2047_v57 }
 0x5b8   :  { %v1031_v48 = vpop.f32.mrf.mxu1 }
 0x5b9   :  { %v1096_v49 = vmax.f32 %v1040_v47, 0.0  ;;  %v1032_v50 = vadd.f32 %v2047_v57, %v1031_v48 }
 0x5ba   :  { %v1658_v51 = vpop.f32.mrf.mxu1 }
 0x5bb   :  { %v1094_v60 = vmax.f32 %v1032_v50, 0.0  ;;  %v1043_v52 = vadd.f32 %v1658_v51, %v2047_v57  ;;  %v2057_v61 = vsel %vm1112_vm0, %v1096_v49, -inf }
 0x5bc   :  { %1133 = vmax.xlane.f32.xlu1 %v2057_v61  ;;  %v1034_v58 = vpop.f32.mrf.mxu1 }
 0x5bd   :  { %v1097_v62 = vmax.f32 %v1043_v52, 0.0  ;;  %v1035_v63 = vadd.f32 %v2047_v57, %v1034_v58  ;;  %v2063_v0 = vsel %vm1112_vm0, %v1094_v60, -inf }
 0x5be   :  { %v1661_v1 = vpop.f32.mrf.mxu1  ;;  %1129 = vmax.xlane.f32.xlu0 %v2063_v0 }
 0x5bf   :  { %v1095_v2 = vmax.f32 %v1035_v63, 0.0  ;;  %v1056_v3 = vadd.f32 %v1661_v1, %v2047_v57  ;;  %v2069_v4 = vsel %vm1112_vm0, %v1097_v62, -inf }
 0x5c0   :  { %1135 = vmax.xlane.f32.xlu1 %v2069_v4  ;;  %v1047_v5 = vpop.f32.mrf.mxu1 }
 0x5c1   :  { %v1100_v6 = vmax.f32 %v1056_v3, 0.0  ;;  %v1048_v7 = vadd.f32 %v2047_v57, %v1047_v5  ;;  %v2075_v8 = vsel %vm1112_vm0, %v1095_v2, -inf }
 0x5c2   :  { %v1662_v9 = vpop.f32.mrf.mxu1  ;;  %1131 = vmax.xlane.f32.xlu0 %v2075_v8 }
 0x5c3   :  { %v1059_v10 = vadd.f32 %v1662_v9, %v2047_v57  ;;  %v1098_v12 = vmax.f32 %v1048_v7, 0.0  ;;  %v2082_v15 = vsel %vm1112_vm0, %v1100_v6, -inf }
 0x5c4   :  { %v1050_v11 = vpop.f32.mrf.mxu1 }
 0x5c5   :  { %v1101_v13 = vmax.f32 %v1059_v10, 0.0  ;;  %v1051_v14 = vadd.f32 %v2047_v57, %v1050_v11  ;;  %v2094_v24 = vsel %vm1112_vm0, %v1098_v12, -inf }
 0x5c6   :  { %v1665_v17 = vpop.f32.mrf.mxu1  ;;  %1141 = vmax.xlane.f32.xlu0 %v2082_v15 }
 0x5c7   :  { %v1099_v18 = vmax.f32 %v1051_v14, 0.0  ;;  %v1072_v19 = vadd.f32 %v1665_v17, %v2047_v57  ;;  %v2088_v20 = vsel %vm1112_vm0, %v1101_v13, -inf }
 0x5c8   :  { %1143 = vmax.xlane.f32.xlu1 %v2088_v20  ;;  %v1063_v21 = vpop.f32.mrf.mxu1 }
 0x5c9   :  { %v1104_v22 = vmax.f32 %v1072_v19, 0.0  ;;  %v1064_v23 = vadd.f32 %v2047_v57, %v1063_v21  ;;  %v2100_v27 = vsel %vm1112_vm0, %v1099_v18, -inf }
 0x5ca   :  { %v1666_v25 = vpop.f32.mrf.mxu1  ;;  %1137 = vmax.xlane.f32.xlu0 %v2094_v24 }
 0x5cb   :  { %v1075_v26 = vadd.f32 %v1666_v25, %v2047_v57  ;;  %v1102_v30 = vmax.f32 %v1064_v23, 0.0  ;;  %v1123_v16 = vsel %vm1112_vm0, %v1104_v22, -inf }
 0x5cc   :  { %v1066_v29 = vpop.f32.mrf.mxu1  ;;  %1139 = vmax.xlane.f32.xlu1 %v2100_v27 }
 0x5cd   :  { %v1105_v31 = vmax.f32 %v1075_v26, 0.0  ;;  %v1067_v32 = vadd.f32 %v2047_v57, %v1066_v29  ;;  %v2115_v38 = vsel %vm1112_vm0, %v1102_v30, -inf }
 0x5ce   :  { %v1669_v33 = vpop.f32.mrf.mxu1  ;;  %1149 = vmax.xlane.f32.xlu0 %v1123_v16 }
 0x5cf   :  { %v1103_v34 = vmax.f32 %v1067_v32, 0.0  ;;  %v2108_v35 = vsel %vm1112_vm0, %v1105_v31, -inf  ;;  %v1088_v28 = vadd.f32 %v1669_v33, %v2047_v57 }
 0x5d0   :  { %v1079_v36 = vpop.f32.mrf.mxu1  ;;  %1151 = vmax.xlane.f32.xlu1 %v2108_v35 }
 0x5d1   :  { %v1080_v37 = vadd.f32 %v2047_v57, %v1079_v36  ;;  %v2120_v41 = vsel %vm1112_vm0, %v1103_v34, -inf  ;;  %v1108_v43 = vmax.f32 %v1088_v28, 0.0 }
 0x5d2   :  { %v1670_v39 = vpop.f32.mrf.mxu1  ;;  %1145 = vmax.xlane.f32.xlu0 %v2115_v38 }
 0x5d3   :  { %v1106_v40 = vmax.f32 %v1080_v37, 0.0  ;;  %v1091_v44 = vadd.f32 %v1670_v39, %v2047_v57  ;;  %v2136_v46 = vsel %vm1112_vm0, %v1108_v43, -inf }
 0x5d4   :  { %v1082_v42 = vpop.f32.mrf.mxu1  ;;  %1147 = vmax.xlane.f32.xlu1 %v2120_v41 }
 0x5d5   :  { %v1083_v45 = vadd.f32 %v2047_v57, %v1082_v42  ;;  %v2127_v53 = vsel %vm1112_vm0, %v1106_v40, -inf  ;;  %v1109_v55 = vmax.f32 %v1091_v44, 0.0 }
 0x5d6   :  { %1153 = vmax.xlane.f32.xlu0 %v2127_v53 }
 0x5d7   :  { %v1107_v54 = vmax.f32 %v1083_v45, 0.0  ;;  %v2142_v57 = vsel %vm1112_vm0, %v1109_v55, -inf }
 0x5d9   :  { %v2132_v56 = vsel %vm1112_vm0, %v1107_v54, -inf }
 0x5da   :  { %1155 = vmax.xlane.f32.xlu1 %v2132_v56  ;;  %1157 = vmax.xlane.f32.xlu0 %v2136_v46 }
 0x5de   :  { %1159 = vmax.xlane.f32.xlu1 %v2142_v57 }
 0x645   :  { %v1134_v47 = vpop.xlane.xlu1 %1133 }
 0x646   :  { %v2146_v48 = vsub.f32 %v2057_v61, %v1134_v47 }
 0x647   :  { %v1130_v49 = vpop.xlane.xlu0 %1129 }
 0x648   :  { %v1181_v50 = vmul.f32 1.442695, %v2146_v48  ;;  %v2150_v51 = vsub.f32 %v2063_v0, %v1130_v49 }
 0x649   :  { %v1136_v60 = vpop.xlane.xlu1 %1135 }
 0x64a   :  { %1721 = vpow2.f32 %v1181_v50  ;;  %v1177_v52 = vmul.f32 1.442695, %v2150_v51  ;;  %v2154_v58 = vsub.f32 %v2069_v4, %v1136_v60 }
 0x64b   :  { %v1132_v62 = vpop.xlane.xlu0 %1131 }
 0x64c   :  { %1723 = vpow2.f32 %v1177_v52  ;;  %v1183_v63 = vmul.f32 1.442695, %v2154_v58  ;;  %v2158_v61 = vsub.f32 %v2075_v8, %v1132_v62 }
 0x64e   :  { %1725 = vpow2.f32 %v1183_v63  ;;  %v1179_v1 = vmul.f32 1.442695, %v2158_v61 }
 0x64f   :  { %v1142_v2 = vpop.xlane.xlu0 %1141 }
 0x650   :  { %1727 = vpow2.f32 %v1179_v1  ;;  %v2162_v0 = vsub.f32 %v2082_v15, %v1142_v2 }
 0x651   :  { %v1144_v3 = vpop.xlane.xlu1 %1143 }
 0x652   :  { %v1189_v5 = vmul.f32 1.442695, %v2162_v0  ;;  %v2166_v4 = vsub.f32 %v2088_v20, %v1144_v3 }
 0x653   :  { %v1138_v6 = vpop.xlane.xlu0 %1137 }
 0x654   :  { %1729 = vpow2.f32 %v1189_v5  ;;  %v1191_v7 = vmul.f32 1.442695, %v2166_v4  ;;  %v2170_v8 = vsub.f32 %v2094_v24, %v1138_v6 }
 0x655   :  { %v1140_v9 = vpop.xlane.xlu1 %1139 }
 0x656   :  { %1731 = vpow2.f32 %v1191_v7  ;;  %v1185_v10 = vmul.f32 1.442695, %v2170_v8  ;;  %v2174_v11 = vsub.f32 %v2100_v27, %v1140_v9 }
 0x657   :  { %v1722_v12 = vpop.eup %1721  ;;  %v1150_v13 = vpop.xlane.xlu0 %1149 }
 0x658   :  { %1733 = vpow2.f32 %v1185_v10  ;;  %v1187_v14 = vmul.f32 1.442695, %v2174_v11  ;;  %v2177_v15 = vsub.f32 %v1123_v16, %v1150_v13  ;;  %v1211_v17 = vsel %vm1112_vm0, %v1722_v12, 0.0 }
 0x659   :  { %v1724_v18 = vpop.eup %1723  ;;  %v1152_v19 = vpop.xlane.xlu1 %1151  ;;  %1229 = vadd.xlane.f32.xlu0 %v1211_v17 }
 0x65a   :  { %1735 = vpow2.f32 %v1187_v14  ;;  %v1197_v20 = vmul.f32 1.442695, %v2177_v15  ;;  %v2183_v21 = vsub.f32 %v2108_v35, %v1152_v19  ;;  %v1209_v24 = vsel %vm1112_vm0, %v1724_v18, 0.0 }
 0x65b   :  { %v1726_v22 = vpop.eup %1725  ;;  %v1146_v23 = vpop.xlane.xlu0 %1145 }
 0x65c   :  { %1737 = vpow2.f32 %v1197_v20  ;;  %v1199_v25 = vmul.f32 1.442695, %v2183_v21  ;;  %v2189_v26 = vsub.f32 %v2115_v38, %v1146_v23  ;;  %v1212_v27 = vsel %vm1112_vm0, %v1726_v22, 0.0 }
 0x65d   :  { %v1728_v29 = vpop.eup %1727  ;;  %1231 = vadd.xlane.f32.xlu1 %v1212_v27  ;;  %v1148_v30 = vpop.xlane.xlu1 %1147  ;;  %1225 = vadd.xlane.f32.xlu0 %v1209_v24 }
 0x65e   :  { %1739 = vpow2.f32 %v1199_v25  ;;  %v1193_v31 = vmul.f32 1.442695, %v2189_v26  ;;  %v2195_v32 = vsub.f32 %v2120_v41, %v1148_v30  ;;  %v1210_v35 = vsel %vm1112_vm0, %v1728_v29, 0.0 }
 0x65f   :  { %v1154_v16 = vpop.xlane.xlu0 %1153 }
 0x660   :  { %1741 = vpow2.f32 %v1193_v31  ;;  %v1195_v33 = vmul.f32 1.442695, %v2195_v32  ;;  %v2199_v34 = vsub.f32 %v2127_v53, %v1154_v16 }
 0x661   :  { %v1730_v36 = vpop.eup %1729  ;;  %1227 = vadd.xlane.f32.xlu1 %v1210_v35 }
 0x662   :  { %1743 = vpow2.f32 %v1195_v33  ;;  %v1201_v28 = vmul.f32 1.442695, %v2199_v34  ;;  %v1215_v37 = vsel %vm1112_vm0, %v1730_v36, 0.0 }
 0x663   :  { %v1732_v38 = vpop.eup %1731  ;;  %v1156_v39 = vpop.xlane.xlu1 %1155  ;;  %1237 = vadd.xlane.f32.xlu0 %v1215_v37 }
 0x664   :  { %v1158_v40 = vpop.xlane.xlu0 %1157  ;;  %1745 = vpow2.f32 %v1201_v28  ;;  %v2207_v41 = vsub.f32 %v2132_v56, %v1156_v39  ;;  %v1216_v43 = vsel %vm1112_vm0, %v1732_v38, 0.0 }
 0x665   :  { %v2210_v42 = vsub.f32 %v2136_v46, %v1158_v40  ;;  %v1734_v44 = vpop.eup %1733  ;;  %1239 = vadd.xlane.f32.xlu1 %v1216_v43 }
 0x666   :  { %v1203_v45 = vmul.f32 1.442695, %v2207_v41  ;;  %v1213_v54 = vsel %vm1112_vm0, %v1734_v44, 0.0 }
 0x667   :  { %v1205_v53 = vmul.f32 1.442695, %v2210_v42  ;;  %v1736_v55 = vpop.eup %1735  ;;  %v1160_v47 = vpop.xlane.xlu1 %1159  ;;  %1233 = vadd.xlane.f32.xlu0 %v1213_v54 }
 0x668   :  { %1747 = vpow2.f32 %v1203_v45  ;;  %v2219_v56 = vsub.f32 %v2142_v57, %v1160_v47  ;;  %v1214_v46 = vsel %vm1112_vm0, %v1736_v55, 0.0 }
 0x669   :  { %v1738_v49 = vpop.eup %1737  ;;  %1749 = vpow2.f32 %v1205_v53  ;;  %1235 = vadd.xlane.f32.xlu1 %v1214_v46 }
 0x66a   :  { %v1207_v50 = vmul.f32 1.442695, %v2219_v56  ;;  %v1219_v60 = vsel %vm1112_vm0, %v1738_v49, 0.0 }
 0x66b   :  { %v1740_v52 = vpop.eup %1739  ;;  %1245 = vadd.xlane.f32.xlu0 %v1219_v60 }
 0x66c   :  { %1751 = vpow2.f32 %v1207_v50  ;;  %v1220_v62 = vsel %vm1112_vm0, %v1740_v52, 0.0 }
 0x66d   :  { %v1742_v63 = vpop.eup %1741  ;;  %1247 = vadd.xlane.f32.xlu1 %v1220_v62 }
 0x66e   :  { %v1217_v57 = vsel %vm1112_vm0, %v1742_v63, 0.0 }
 0x66f   :  { %v1744_v1 = vpop.eup %1743  ;;  %1241 = vadd.xlane.f32.xlu0 %v1217_v57 }
 0x670   :  { %v1218_v2 = vsel %vm1112_vm0, %v1744_v1, 0.0 }
 0x671   :  { %v1746_v3 = vpop.eup %1745  ;;  %1243 = vadd.xlane.f32.xlu1 %v1218_v2 }
 0x672   :  { %v1221_v5 = vsel %vm1112_vm0, %v1746_v3, 0.0 }
 0x673   :  { %1249 = vadd.xlane.f32.xlu0 %v1221_v5 }
 0x675   :  { %v1748_v6 = vpop.eup %1747 }
 0x676   :  { %v1750_v7 = vpop.eup %1749  ;;  %v1222_v9 = vsel %vm1112_vm0, %v1748_v6, 0.0 }
 0x677   :  { %1251 = vadd.xlane.f32.xlu1 %v1222_v9  ;;  %v1223_v10 = vsel %vm1112_vm0, %v1750_v7, 0.0 }
 0x678   :  { %1253 = vadd.xlane.f32.xlu0 %v1223_v10 }
 0x679   :  { %v1752_v12 = vpop.eup %1751 }
 0x67a   :  { %v1224_v13 = vsel %vm1112_vm0, %v1752_v12, 0.0 }
 0x67b   :  { %1255 = vadd.xlane.f32.xlu1 %v1224_v13 }
 0x6e2   :  { %v1230_v14 = vpop.xlane.xlu0 %1229 }
 0x6e3   :  { %1753 = vlog2.f32 %v1230_v14 }
 0x6e6   :  { %v1232_v17 = vpop.xlane.xlu1 %1231  ;;  %v1226_v18 = vpop.xlane.xlu0 %1225 }
 0x6e7   :  { %1755 = vlog2.f32 %v1232_v17 }
 0x6e8   :  { %1757 = vlog2.f32 %v1226_v18 }
 0x6ea   :  { %v1228_v19 = vpop.xlane.xlu1 %1227 }
 0x6eb   :  { %1759 = vlog2.f32 %v1228_v19 }
 0x6ec   :  { %v1238_v20 = vpop.xlane.xlu0 %1237 }
 0x6ed   :  { %1761 = vlog2.f32 %v1238_v20 }
 0x6ee   :  { %v1240_v22 = vpop.xlane.xlu1 %1239 }
 0x6ef   :  { %1763 = vlog2.f32 %v1240_v22 }
 0x6f0   :  { %v1754_v23 = vpop.eup %1753  ;;  %v1234_v24 = vpop.xlane.xlu0 %1233 }
 0x6f1   :  { %v1262_v25 = vmul.f32 0.6931472, %v1754_v23  ;;  %1765 = vlog2.f32 %v1234_v24 }
 0x6f2   :  { %v1236_v27 = vpop.xlane.xlu1 %1235 }
 0x6f3   :  { %v1291_v59 = vsub.f32 %v2146_v48, %v1262_v25  ;;  %1767 = vlog2.f32 %v1236_v27 }
 0x6f4   :  { %v1756_v29 = vpop.eup %1755  ;;  %v1246_v30 = vpop.xlane.xlu0 %1245 }
 0x6f5   :  { %v1758_v31 = vpop.eup %1757  ;;  %1307 = vst [vmem:[#allocation11 + $0x10] sm:$0xff] %v1291_v59  ;;  %v1264_v16 = vmul.f32 0.6931472, %v1756_v29  ;;  %1769 = vlog2.f32 %v1246_v30 }
 0x6f6   :  { %v1258_v33 = vmul.f32 0.6931472, %v1758_v31  ;;  %v1248_v35 = vpop.xlane.xlu1 %1247 }
 0x6f7   :  { %v1292_v36 = vsub.f32 %v2154_v58, %v1264_v16  ;;  %1771 = vlog2.f32 %v1248_v35 }
 0x6f8   :  { %v1760_v28 = vpop.eup %1759  ;;  %v1289_v37 = vsub.f32 %v2150_v51, %v1258_v33  ;;  %v1242_v38 = vpop.xlane.xlu0 %1241 }
 0x6f9   :  { %1308 = vst [vmem:[#allocation11 + $0x18] sm:$0xff] %v1292_v36  ;;  %v1260_v39 = vmul.f32 0.6931472, %v1760_v28  ;;  %1773 = vlog2.f32 %v1242_v38 }
 0x6fa   :  { %v1762_v48 = vpop.eup %1761  ;;  %1305 = vst [vmem:[#allocation11] sm:$0xff] %v1289_v37  ;;  %v1244_v40 = vpop.xlane.xlu1 %1243 }
 0x6fb   :  { %v1290_v43 = vsub.f32 %v2158_v61, %v1260_v39  ;;  %v1270_v44 = vmul.f32 0.6931472, %v1762_v48  ;;  %1775 = vlog2.f32 %v1244_v40 }
 0x6fc   :  { %v1764_v45 = vpop.eup %1763  ;;  %v1250_v53 = vpop.xlane.xlu0 %1249 }
 0x6fd   :  { %1306 = vst [vmem:[#allocation11 + $0x8] sm:$0xff] %v1290_v43  ;;  %v1295_v58 = vsub.f32 %v2162_v0, %v1270_v44  ;;  %v1272_v54 = vmul.f32 0.6931472, %v1764_v45  ;;  %1777 = vlog2.f32 %v1250_v53 }
 0x6fe   :  { %v1766_v55 = vpop.eup %1765 }
 0x6ff   :  { %1311 = vst [vmem:[#allocation11 + $0x30] sm:$0xff] %v1295_v58  ;;  %v1296_v51 = vsub.f32 %v2166_v4, %v1272_v54  ;;  %v1266_v47 = vmul.f32 0.6931472, %v1766_v55 }
 0x700   :  { %v1768_v46 = vpop.eup %1767  ;;  %v1252_v49 = vpop.xlane.xlu1 %1251 }
 0x701   :  { %1312 = vst [vmem:[#allocation11 + $0x38] sm:$0xff] %v1296_v51  ;;  %v1293_v50 = vsub.f32 %v2170_v8, %v1266_v47  ;;  %v1268_v61 = vmul.f32 0.6931472, %v1768_v46  ;;  %1779 = vlog2.f32 %v1252_v49  ;;  %v1254_v60 = vpop.xlane.xlu0 %1253 }
 0x702   :  { %v1770_v52 = vpop.eup %1769  ;;  %1781 = vlog2.f32 %v1254_v60 }
 0x703   :  { %1309 = vst [vmem:[#allocation11 + $0x20] sm:$0xff] %v1293_v50  ;;  %v1294_v0 = vsub.f32 %v2174_v11, %v1268_v61  ;;  %v1278_v62 = vmul.f32 0.6931472, %v1770_v52 }
 0x704   :  { %v1772_v63 = vpop.eup %1771  ;;  %v1256_v57 = vpop.xlane.xlu1 %1255 }
 0x705   :  { %1310 = vst [vmem:[#allocation11 + $0x28] sm:$0xff] %v1294_v0  ;;  %v1299_v4 = vsub.f32 %v2177_v15, %v1278_v62  ;;  %v1280_v1 = vmul.f32 0.6931472, %v1772_v63  ;;  %1783 = vlog2.f32 %v1256_v57 }
 0x706   :  { %v1774_v2 = vpop.eup %1773 }
 0x707   :  { %1315 = vst [vmem:[#allocation11 + $0x50] sm:$0xff] %v1299_v4  ;;  %v1300_v8 = vsub.f32 %v2183_v21, %v1280_v1  ;;  %v1274_v3 = vmul.f32 0.6931472, %v1774_v2 }
 0x708   :  { %v1776_v5 = vpop.eup %1775 }
 0x709   :  { %1316 = vst [vmem:[#allocation11 + $0x58] sm:$0xff] %v1300_v8  ;;  %v1297_v6 = vsub.f32 %v2189_v26, %v1274_v3  ;;  %v1276_v7 = vmul.f32 0.6931472, %v1776_v5 }
 0x70a   :  { %v1778_v9 = vpop.eup %1777 }
 0x70b   :  { %1313 = vst [vmem:[#allocation11 + $0x40] sm:$0xff] %v1297_v6  ;;  %v1298_v11 = vsub.f32 %v2195_v32, %v1276_v7  ;;  %v1282_v10 = vmul.f32 0.6931472, %v1778_v9 }
 0x70d   :  { %1314 = vst [vmem:[#allocation11 + $0x48] sm:$0xff] %v1298_v11  ;;  %v1301_v15 = vsub.f32 %v2199_v34, %v1282_v10 }
 0x70e   :  { %v1780_v12 = vpop.eup %1779 }
 0x70f   :  { %v1782_v13 = vpop.eup %1781  ;;  %1317 = vst [vmem:[#allocation11 + $0x60] sm:$0xff] %v1301_v15  ;;  %v1284_v14 = vmul.f32 0.6931472, %v1780_v12 }
 0x710   :  { %v1286_v17 = vmul.f32 0.6931472, %v1782_v13 }
 0x711   :  { %v1302_v21 = vsub.f32 %v2207_v41, %v1284_v14 }
 0x712   :  { %v1784_v18 = vpop.eup %1783  ;;  %v1303_v19 = vsub.f32 %v2210_v42, %v1286_v17 }
 0x713   :  { %1318 = vst [vmem:[#allocation11 + $0x68] sm:$0xff] %v1302_v21  ;;  %v1288_v26 = vmul.f32 0.6931472, %v1784_v18 }
 0x714   :  { %1319 = vst [vmem:[#allocation11 + $0x70] sm:$0xff] %v1303_v19 }
 0x715   :  { %v1304_v32 = vsub.f32 %v2219_v56, %v1288_v26 }
 0x717   :  { %1320 = vst [vmem:[#allocation11 + $0x78] sm:$0xff] %v1304_v32 }
 0x718   :  { %1896 = shalt.err (!%p1893_p1)
}
 0x719   :  { %s1921_s11 = smov 128   ;;  %s1922_s12 = smov 8  }
 0x71a   :  { %1332 = dma.vmem_to_hbm [thread:$0]  %s1327_s9, 2048, %s2267_s8, [#allocation4], %s1921_s11, %s1921_s11, %s1922_s12  }
 0x71b   :  { %1911 = dma.done.wait [#allocation4], 2048  }
 0x71c   :  { %1912 = vsyncadd [#allocation4], 4294965248 }
 0x71d   :  { %1336 = vsyncpa [#allocation3], 1 }
 0x71e   :  { %1337 = vsyncpa [#allocation6], 1 }
 0x71f   :  { %1338 = vsyncpa [#allocation9], 1 }
 0x720   :  { %1339 = vsyncpa [#allocation4], 1 }

</bundles_post_ra>
